<compile_context>
chip_gen: v5e
topology: v5e:2x2
jax: 0.10.0
libtpu: 0.0.40
codegen_flags: <defaults>
</compile_context>

<pallas_src>
import jax
import jax.numpy as jnp
from jax.experimental import pallas as pl
from jax.experimental.pallas import tpu as pltpu


def _flatten_copy_kernel(x_ref, o_ref):
    # Identity copy of one (TB, TF) tile of the flattened (B, C*H*W) slab.
    o_ref[...] = x_ref[...]


def _sublane_quantum(dtype) -> int:
    # Packed-dtype sublane multiples: f32 -> 8, bf16 -> 16, int8/fp8 -> 32.
    return {4: 8, 2: 16, 1: 32}.get(jnp.dtype(dtype).itemsize, 8)


def flatten_layer(x, *, tb_max: int = 512, tf_max: int = 2048):
    """Pallas equivalent of FlattenLayer.forward: x.view(B, -1)."""
    B = x.shape[0]
    flat = 1
    for d in x.shape[1:]:
        flat *= d

    # Row-major flatten (matches torch .view on a contiguous NCHW tensor).
    # This is layout glue only; the kernel below just materializes it.
    x2 = jnp.reshape(x, (B, flat))

    # Tile sizes: full extent if small, otherwise a hardware-aligned tile.
    sub_q = _sublane_quantum(x2.dtype)
    tb = B if B <= tb_max else max((tb_max // sub_q) * sub_q, sub_q)
    tf = flat if flat <= tf_max else max((tf_max // 128) * 128, 128)

    grid = (pl.cdiv(B, tb), pl.cdiv(flat, tf))

    return pl.pallas_call(
        _flatten_copy_kernel,
        out_shape=jax.ShapeDtypeStruct((B, flat), x2.dtype),
        grid=grid,
        in_specs=[pl.BlockSpec((tb, tf), lambda i, j: (i, j))],
        out_specs=pl.BlockSpec((tb, tf), lambda i, j: (i, j)),
        # Output aliases the flattened input: no extra HBM allocation, and the
        # in-place identity copy is trivially safe (each step reads/writes the
        # same block).
        input_output_aliases={0: 0},
        compiler_params=pltpu.CompilerParams(
            # Every block is independent -> both axes parallel (megacore on v7x).
            dimension_semantics=("parallel", "parallel"),
        ),
    )(x2)


if __name__ == "__main__":
    key = jax.random.PRNGKey(0)
    # Small NCHW input consistent with a conv-net feature map: (B=2, C=4, H=16, W=16)
    x = jax.random.normal(key, (2, 4, 16, 16), dtype=jnp.float32)

    # Reference (same semantics as torch .view(B, -1)); computed before the
    # kernel call since the kernel's aliased input buffer is donated.
    ref = jnp.reshape(x, (x.shape[0], -1))
    ref = jax.block_until_ready(ref)

    out = jax.jit(flatten_layer)(x)
    out = jax.block_until_ready(out)

    assert out.shape == (2, 4 * 16 * 16), out.shape
    assert out.dtype == ref.dtype
    assert bool(jnp.array_equal(out, ref))

    print("KERNEL_OK")
</pallas_src>

<mosaic_0001>
module attributes {stable_mosaic.version = 11 : i64} {
  func.func @_flatten_copy_kernel(%arg0: i32, %arg1: i32, %arg2: memref<2x1024xf32, #tpu.memory_space<vmem>>, %arg3: memref<2x1024xf32, #tpu.memory_space<vmem>>) attributes {dimension_semantics = [#tpu.dimension_semantics<parallel>, #tpu.dimension_semantics<parallel>], iteration_bounds = array<i64: 1, 1>, scalar_prefetch = 0 : i64, scratch_operands = 0 : i64, tpu.core_type = #tpu.core_type<tc>, window_params = [{transform_indices = @transform_0, window_bounds = array<i64: 2, 1024>}, {transform_indices = @transform_1, window_bounds = array<i64: 2, 1024>}]} {
    %c0 = arith.constant 0 : index
    %c0_0 = arith.constant 0 : index
    %0 = vector.load %arg2[%c0, %c0_0] : memref<2x1024xf32, #tpu.memory_space<vmem>>, vector<2x1024xf32>
    %c0_1 = arith.constant 0 : index
    %c0_2 = arith.constant 0 : index
    %1 = vector.load %arg3[%c0_1, %c0_2] : memref<2x1024xf32, #tpu.memory_space<vmem>>, vector<2x1024xf32>
    tpu.vector_store %arg3[%c0_1, %c0_2], %0 {strides = array<i32>} : memref<2x1024xf32, #tpu.memory_space<vmem>>, vector<2x1024xf32>,
    return
  }
  func.func @transform_0(%arg0: i32, %arg1: i32) -> (i32, i32) {
    %c0_i32 = arith.constant 0 : i32
    return %arg0, %arg1 : i32, i32
  }
  func.func @transform_1(%arg0: i32, %arg1: i32) -> (i32, i32) {
    %c0_i32 = arith.constant 0 : i32
    return %arg0, %arg1 : i32, i32
  }
}

</mosaic_0001>

<bundles_post_ra>
// kernel: flatten_layer.1
= control target key start
LH: loop header
LB: loop body
LE: loop exit
PB: predicated region body
PF: predicated region fallthrough
CT: control target
= control target key end

     0   :  { %6 = vsyncpa [#allocation3], 0  ;;  %s116_s0 = inlined_call_operand.hbm [shape: f32[2,1024], index: 0, kind: input, shape index: {}, may-alias: {0,1}]   ;;  %s117_s1 = inlined_call_operand.hbm [shape: f32[2,1024], index: 1, kind: output, shape index: {}, may-alias: {0,1}]  }
   0x1   :  { %7 = vsyncpa [#allocation4], 0  ;;  %s13_s8 = sshll.u32 %s116_s0, 4  ;;  %s98_s9 = smov [#allocation2]   ;;  %s14_s8 = int_to_ptr.hbm [resolvable:$true] %s13_s8 }
   0x2   :  { %s15_s10 = sshll.u32 %s98_s9, 4  ;;  %s16_s10 = int_to_ptr.vmem [resolvable:$true] %s15_s10 }
   0x3   :  { %18 = dma.hbm_to_vmem [thread:$0]  %s14_s8, 256, %s16_s10, [#allocation3]  }
   0x4   :  { %94 = dma.done.wait [#allocation3], 256  }
   0x5   :  { %95 = vsyncadd [#allocation3], 4294967040  ;;  %s99_s11 = smov [#allocation5]   ;;  %s34_s15 = sshll.u32 %s117_s1, 4  ;;  %v23_v0 = vld [vmem:[#allocation2] sm:$0xff]  ;;  %v24_v1 = vld [vmem:[#allocation2 + $0x8] sm:$0xff]  ;;  %s35_s15 = int_to_ptr.hbm [resolvable:$true] %s34_s15 }
   0x6   :  { %s32_s12 = sshll.u32 %s99_s11, 4  ;;  %25 = vst [vmem:[#allocation5] sm:$0xff] %v23_v0  ;;  %s33_s12 = int_to_ptr.vmem [resolvable:$true] %s32_s12 }
   0x7   :  { %26 = vst [vmem:[#allocation5 + $0x8] sm:$0xff] %v24_v1 }
   0x8   :  { %37 = dma.vmem_to_hbm [thread:$0]  %s33_s12, 256, %s35_s15, [#allocation4]  }
   0x9   :  { %96 = dma.done.wait [#allocation4], 256  }
   0xa   :  { %97 = vsyncadd [#allocation4], 4294967040 }
   0xb   :  { %42 = vsyncpa [#allocation3], 1 }
   0xc   :  { %43 = vsyncpa [#allocation4], 1 }

</bundles_post_ra>
